<compile_context>
chip_gen: v5e
topology: v5e:2x2
jax: 0.10.0
libtpu: 0.0.40
codegen_flags: <defaults>
</compile_context>

<pallas_src>
from functools import partial
from math import gcd

import jax
import jax.numpy as jnp
from jax.experimental import pallas as pl
from jax.experimental.pallas import tpu as pltpu

_LANE = 128


def _linear_kernel(x_ref, w_ref, b_ref, o_ref):
    # x_ref: (tile, PACK*cin), w_ref: (PACK*cin, PACK*cout),
    # b_ref: (1, PACK*cout),   o_ref: (tile, PACK*cout)
    acc = jnp.dot(x_ref[...], w_ref[...], preferred_element_type=jnp.float32)
    o_ref[...] = (acc + b_ref[...]).astype(o_ref.dtype)


def _lcm(a, b):
    return a * b // gcd(a, b)


def _pack_factor(cin, cout):
    """Rows folded per packed row so input & output lanes are 128-dense."""
    pack_out = _LANE // gcd(_LANE, cout)   # output-store density (the big lever)
    pack_in = _LANE // gcd(_LANE, cin)     # input-load density
    pack = _lcm(pack_out, pack_in)
    # Keep the block-diagonal weight a small VMEM-resident tile; if the full
    # lcm is too large, fall back to output-only packing, then to none.
    if pack * cin > 512 or pack * cout > 2048:
        pack = pack_out
    if pack * cout > 2048:
        pack = 1
    return max(pack, 1)


@partial(jax.jit, static_argnames=("tile_rows",))
def brdf_embed_block(x, weight, bias, *, tile_rows=2048):
    """Pallas equivalent of BRDF_EmbedBlock.forward (y = x @ W^T + b).

    x:      (N, brdf_input_size)                float32
    weight: (brdf_embed_size, brdf_input_size)  PyTorch Linear convention
    bias:   (brdf_embed_size,)
    returns (N, brdf_embed_size)

    tile_rows = number of *packed* rows per grid step (each packed row holds
    PACK original rows).
    """
    n, cin = x.shape
    cout, cin_w = weight.shape
    assert cin == cin_w, "weight / input feature mismatch"

    dtype = x.dtype
    w_t = weight.T.astype(dtype)  # (cin, cout)

    pack = _pack_factor(cin, cout)

    # Pad the row count to a multiple of the packing factor.
    n_pad = pl.cdiv(n, pack) * pack
    if n_pad != n:
        x = jnp.pad(x, ((0, n_pad - n), (0, 0)))
    rows = n_pad // pack  # packed rows

    x_p = x.reshape(rows, pack * cin)
    # Block-diagonal weight: kron(I_pack, W^T) -> (pack*cin, pack*cout).
    w_p = jnp.kron(jnp.eye(pack, dtype=dtype), w_t)
    b_p = jnp.tile(bias.astype(dtype), pack).reshape(1, pack * cout)

    # Tile over packed rows; keep the tile a multiple of 8 (sublane rule)
    # unless it spans the full extent.
    tile = min(tile_rows, rows)
    if tile < rows:
        tile = max(8, (tile // 8) * 8)
    grid = (pl.cdiv(rows, tile),)

    out_p = pl.pallas_call(
        _linear_kernel,
        out_shape=jax.ShapeDtypeStruct((rows, pack * cout), dtype),
        grid_spec=pltpu.PrefetchScalarGridSpec(
            num_scalar_prefetch=0,
            grid=grid,
            in_specs=[
                pl.BlockSpec((tile, pack * cin), lambda i: (i, 0)),
                pl.BlockSpec((pack * cin, pack * cout), lambda i: (0, 0)),
                pl.BlockSpec((1, pack * cout), lambda i: (0, 0)),
            ],
            out_specs=pl.BlockSpec((tile, pack * cout), lambda i: (i, 0)),
        ),
        compiler_params=pltpu.CompilerParams(
            # Independent rows -> shard grid steps across v7x's 2 TensorCores.
            dimension_semantics=("parallel",),
        ),
    )(x_p, w_p, b_p)

    # Unpack lanes back to (N, cout) and drop padded rows.
    return out_p.reshape(n_pad, cout)[:n]


if __name__ == "__main__":
    brdf_input_size = 8
    brdf_embed_size = 32
    batch = 4

    key = jax.random.PRNGKey(0)
    kx, kw, kb, kx2 = jax.random.split(key, 4)

    # Deterministic synthetic parameters (Linear: weight [out, in], bias [out]).
    weight = jax.random.normal(
        kw, (brdf_embed_size, brdf_input_size), dtype=jnp.float32
    ) * (2.0 / brdf_input_size) ** 0.5
    bias = jax.random.normal(kb, (brdf_embed_size,), dtype=jnp.float32) * 0.01

    # Small demo batch (matches the module's per-sample BRDF embedding).
    x = jax.random.normal(kx, (batch, brdf_input_size), dtype=jnp.float32)
    out = jax.block_until_ready(brdf_embed_block(x, weight, bias))
    ref = x @ weight.T + bias
    assert out.shape == (batch, brdf_embed_size)
    assert jnp.allclose(out, ref, atol=1e-5, rtol=1e-5)

    # Exercise the tiled / multi-grid-step path (small tile to force several
    # grid steps, including a partial edge block and row padding).
    n2 = 1030
    x2 = jax.random.normal(kx2, (n2, brdf_input_size), dtype=jnp.float32)
    out2 = jax.block_until_ready(brdf_embed_block(x2, weight, bias, tile_rows=64))
    ref2 = x2 @ weight.T + bias
    assert out2.shape == (n2, brdf_embed_size)
    assert jnp.allclose(out2, ref2, atol=1e-5, rtol=1e-5)

    print("KERNEL_OK")
</pallas_src>

<mosaic_0001>
module attributes {stable_mosaic.version = 11 : i64} {
  func.func @_linear_kernel(%arg0: i32, %arg1: memref<1x128xf32, #tpu.memory_space<vmem>>, %arg2: memref<128x512xf32, #tpu.memory_space<vmem>>, %arg3: memref<1x512xf32, #tpu.memory_space<vmem>>, %arg4: memref<1x512xf32, #tpu.memory_space<vmem>>) attributes {dimension_semantics = [#tpu.dimension_semantics<parallel>], iteration_bounds = array<i64: 1>, scalar_prefetch = 0 : i64, scratch_operands = 0 : i64, tpu.core_type = #tpu.core_type<tc>, window_params = [{transform_indices = @transform_0, window_bounds = array<i64: 1, 128>}, {pipeline_mode = #tpu.pipeline_mode<synchronous>, transform_indices = @transform_1, window_bounds = array<i64: 128, 512>}, {pipeline_mode = #tpu.pipeline_mode<synchronous>, transform_indices = @transform_2, window_bounds = array<i64: 1, 512>}, {transform_indices = @transform_3, window_bounds = array<i64: 1, 512>}]} {
    %c0 = arith.constant 0 : index
    %c0_0 = arith.constant 0 : index
    %0 = vector.load %arg1[%c0, %c0_0] : memref<1x128xf32, #tpu.memory_space<vmem>>, vector<1x128xf32>
    %c0_1 = arith.constant 0 : index
    %c0_2 = arith.constant 0 : index
    %1 = vector.load %arg2[%c0_1, %c0_2] : memref<128x512xf32, #tpu.memory_space<vmem>>, vector<128x512xf32>
    %cst = arith.constant dense<0.000000e+00> : vector<1x512xf32>
    %2 = tpu.matmul %0, %1, %cst {dimension_numbers = #tpu.dot_dimension_numbers<[1], [0], [0], [1], [0, 0, 1, 1], [], []>} : vector<1x128xf32>, vector<128x512xf32>, vector<1x512xf32> -> vector<1x512xf32>
    %c0_3 = arith.constant 0 : index
    %c0_4 = arith.constant 0 : index
    %3 = vector.load %arg3[%c0_3, %c0_4] : memref<1x512xf32, #tpu.memory_space<vmem>>, vector<1x512xf32>
    %4 = arith.addf %2, %3 : vector<1x512xf32>
    %c0_5 = arith.constant 0 : index
    %c0_6 = arith.constant 0 : index
    %5 = vector.load %arg4[%c0_5, %c0_6] : memref<1x512xf32, #tpu.memory_space<vmem>>, vector<1x512xf32>
    tpu.vector_store %arg4[%c0_5, %c0_6], %4 {strides = array<i32>} : memref<1x512xf32, #tpu.memory_space<vmem>>, vector<1x512xf32>,
    return
  }
  func.func @transform_0(%arg0: i32) -> (i32, i32) {
    %c0_i32 = arith.constant 0 : i32
    %c0_i32_0 = arith.constant 0 : i32
    return %arg0, %c0_i32 : i32, i32
  }
  func.func @transform_1(%arg0: i32) -> (i32, i32) {
    %c0_i32 = arith.constant 0 : i32
    %c0_i32_0 = arith.constant 0 : i32
    %c0_i32_1 = arith.constant 0 : i32
    return %c0_i32, %c0_i32_0 : i32, i32
  }
  func.func @transform_2(%arg0: i32) -> (i32, i32) {
    %c0_i32 = arith.constant 0 : i32
    %c0_i32_0 = arith.constant 0 : i32
    %c0_i32_1 = arith.constant 0 : i32
    return %c0_i32, %c0_i32_0 : i32, i32
  }
  func.func @transform_3(%arg0: i32) -> (i32, i32) {
    %c0_i32 = arith.constant 0 : i32
    %c0_i32_0 = arith.constant 0 : i32
    return %arg0, %c0_i32 : i32, i32
  }
}

</mosaic_0001>

<bundles_post_ra>
// kernel: tile.8
= control target key start
LH: loop header
LB: loop body
LE: loop exit
PB: predicated region body
PF: predicated region fallthrough
CT: control target
= control target key end

     0   :  { %s28_s0 = inlined_call_operand.vmem [shape: f32[32], index: 0, kind: input, shape index: {}]   ;;  %s29_s1 = inlined_call_operand.vmem [shape: f32[16,32], index: 1, kind: output, shape index: {}]  }
   0x1   :  { %v4_v0 = vld [vmem:[%s28_s0] ss:$0 sm:$0xff] }
   0x2   :  { %5 = vst [vmem:[%s29_s1] sm:$0xff] %v4_v0 }
   0x3   :  { %8 = vst [vmem:[%s29_s1 + $0x8] sm:$0xff] %v4_v0 }

// kernel: tile.9
= control target key start
LH: loop header
LB: loop body
LE: loop exit
PB: predicated region body
PF: predicated region fallthrough
CT: control target
= control target key end

     0   :  { %s56_s8 = smov 96   ;;  %s57_s11 = smov 32   ;;  %vm3_vm0 = vcmask 261120   ;;  %vm9_vm1 = vcmask 1048320   ;;  %vm15_vm2 = vcmask 785920   ;;  %vm21_vm3 = vcmask 523520   ;;  %s93_s0 = inlined_call_operand.vmem [shape: f32[16,32], index: 0, kind: input, shape index: {}]   ;;  %s94_s1 = inlined_call_operand.vmem [shape: f32[1,512], index: 1, kind: output, shape index: {}]  }
   0x1   :  { %v47_v0 = vld [vmem:[%s93_s0 + $0x3] ss:$4 sm:$0xf]   ;;  %v49_v1 = vld [vmem:[%s93_s0 + $0x1] ss:$4 sm:$0xf]  }
   0x2   :  { %7 = vrot.lane.b32.xlu0 %v47_v0, %s56_s8  ;;  %19 = vrot.lane.b32.xlu1 %v49_v1, %s57_s11  ;;  %v48_v2 = vld [vmem:[%s93_s0 + $0x2] ss:$4 sm:$0xf]   ;;  %s58_s14 = smov 64  }
   0x3   :  { %v2_v3 = vld [vmem:[%s93_s0] ss:$4 sm:$0xf]  }
   0x4   :  { %4 = vst.msk [vmem:[#allocation0] ss:$8 sm:$0xf] %vm3_vm0, %v2_v3  }
   0xa   :  { %13 = vrot.lane.b32.xlu0 %v48_v2, %s58_s14 }
  0x74   :  { %v8_v4 = vpop.permute.xlu0 %7   ;;  %v20_v5 = vpop.permute.xlu1 %19  }
  0x75   :  { %10 = vst.msk [vmem:[#allocation0] ss:$8 sm:$0xf] %vm9_vm1, %v8_v4  }
  0x7c   :  { %v14_v6 = vpop.permute.xlu0 %13  }
  0x7d   :  { %16 = vst.msk [vmem:[#allocation0] ss:$8 sm:$0xf] %vm15_vm2, %v14_v6  }
  0x7e   :  { %22 = vst.msk [vmem:[#allocation0] ss:$8 sm:$0xf] %vm21_vm3, %v20_v5  }
  0x85   :  { %v25_v7 = vld [vmem:[#allocation0] sm:$0x1]  ;;  %v30_v8 = vld [vmem:[#allocation0 + $0x8] sm:$0x1]  ;;  %v36_v9 = vld [vmem:[#allocation0 + $0x10] sm:$0x1] }
  0x86   :  { %28 = vst [vmem:[%s94_s1] sm:$0x1] %v25_v7  ;;  %v42_v10 = vld [vmem:[#allocation0 + $0x18] sm:$0x1] }
  0x87   :  { %50 = vst [vmem:[%s94_s1 + $0x1] sm:$0x1] %v30_v8 }
  0x88   :  { %51 = vst [vmem:[%s94_s1 + $0x2] sm:$0x1] %v36_v9 }
  0x89   :  { %52 = vst [vmem:[%s94_s1 + $0x3] sm:$0x1] %v42_v10 }

// kernel: brdf_embed_block.1
= control target key start
LH: loop header
LB: loop body
LE: loop exit
PB: predicated region body
PF: predicated region fallthrough
CT: control target
= control target key end

     0   :  { %vm176_vm0 = vcmask 1040384   ;;  %vm178_vm1 = vcmask 1042434   ;;  %vm180_vm2 = vcmask 1041408   ;;  %s413_s1 = inlined_call_operand.vmem [shape: f32[128,512], index: 1, kind: input, shape index: {}]   ;;  %s414_s0 = inlined_call_operand.vmem [shape: f32[1,128], index: 0, kind: input, shape index: {}]   ;;  %s415_s2 = inlined_call_operand.vmem [shape: f32[1,512], index: 2, kind: input, shape index: {}]   ;;  %s416_s3 = inlined_call_operand.vmem [shape: f32[1,512], index: 3, kind: output, shape index: {}]  }
   0x1   :  { %v77_v0 = vld [vmem:[%s413_s1 + $0x1f0] sm:$0xff]  ;;  %v78_v1 = vld [vmem:[%s413_s1 + $0x1f8] sm:$0xff]  ;;  %v76_v6 = vld [vmem:[%s413_s1 + $0x1e8] sm:$0xff] }
   0x2   :  { %v73_v2 = vld [vmem:[%s413_s1 + $0x1d0] sm:$0xff]  ;;  %129 = vmatpush.msra.mxu2 %v77_v0  ;;  %149 = vmatpush.msra.mxu3 %v78_v1  ;;  %v74_v3 = vld [vmem:[%s413_s1 + $0x1d8] sm:$0xff]  ;;  %v75_v7 = vld [vmem:[%s413_s1 + $0x1e0] sm:$0xff] }
   0x3   :  { %v69_v4 = vld [vmem:[%s413_s1 + $0x1b0] sm:$0xff]  ;;  %v70_v5 = vld [vmem:[%s413_s1 + $0x1b8] sm:$0xff]  ;;  %v72_v8 = vld [vmem:[%s413_s1 + $0x1c8] sm:$0xff]  ;;  %109 = vmatpush.msra.mxu1 %v76_v6  ;;  %89 = vmatpush.msra.mxu0 %v75_v7 }
   0x4   :  { %130 = vmatpush.msra.mxu2 %v73_v2  ;;  %150 = vmatpush.msra.mxu3 %v74_v3  ;;  %v65_v9 = vld [vmem:[%s413_s1 + $0x190] sm:$0xff]  ;;  %v66_v10 = vld [vmem:[%s413_s1 + $0x198] sm:$0xff]  ;;  %v71_v11 = vld [vmem:[%s413_s1 + $0x1c0] sm:$0xff] }
   0x5   :  { %v68_v12 = vld [vmem:[%s413_s1 + $0x1a8] sm:$0xff]  ;;  %v67_v13 = vld [vmem:[%s413_s1 + $0x1a0] sm:$0xff]  ;;  %110 = vmatpush.msra.mxu1 %v72_v8  ;;  %v61_v14 = vld [vmem:[%s413_s1 + $0x170] sm:$0xff]  ;;  %90 = vmatpush.msra.mxu0 %v71_v11 }
   0x6   :  { %131 = vmatpush.msra.mxu2 %v69_v4  ;;  %151 = vmatpush.msra.mxu3 %v70_v5  ;;  %v62_v15 = vld [vmem:[%s413_s1 + $0x178] sm:$0xff]  ;;  %v64_v16 = vld [vmem:[%s413_s1 + $0x188] sm:$0xff]  ;;  %v63_v17 = vld [vmem:[%s413_s1 + $0x180] sm:$0xff] }
   0x7   :  { %111 = vmatpush.msra.mxu1 %v68_v12  ;;  %v57_v18 = vld [vmem:[%s413_s1 + $0x150] sm:$0xff]  ;;  %v58_v19 = vld [vmem:[%s413_s1 + $0x158] sm:$0xff]  ;;  %91 = vmatpush.msra.mxu0 %v67_v13  ;;  %v60_v20 = vld [vmem:[%s413_s1 + $0x168] sm:$0xff]  ;;  %v183_v12 = vlaneseq }
   0x8   :  { %132 = vmatpush.msra.mxu2 %v65_v9  ;;  %152 = vmatpush.msra.mxu3 %v66_v10  ;;  %v59_v21 = vld [vmem:[%s413_s1 + $0x160] sm:$0xff]  ;;  %v53_v22 = vld [vmem:[%s413_s1 + $0x130] sm:$0xff]  ;;  %v54_v23 = vld [vmem:[%s413_s1 + $0x138] sm:$0xff] }
   0x9   :  { %112 = vmatpush.msra.mxu1 %v64_v16  ;;  %92 = vmatpush.msra.mxu0 %v63_v17  ;;  %v56_v24 = vld [vmem:[%s413_s1 + $0x148] sm:$0xff]  ;;  %v55_v25 = vld [vmem:[%s413_s1 + $0x140] sm:$0xff]  ;;  %v49_v26 = vld [vmem:[%s413_s1 + $0x110] sm:$0xff]  ;;  %vm185_vm3 = vcmp.lt.s32.totalorder %v183_v12, 512 }
   0xa   :  { %133 = vmatpush.msra.mxu2 %v61_v14  ;;  %153 = vmatpush.msra.mxu3 %v62_v15  ;;  %v50_v27 = vld [vmem:[%s413_s1 + $0x118] sm:$0xff]  ;;  %v52_v28 = vld [vmem:[%s413_s1 + $0x128] sm:$0xff]  ;;  %v51_v29 = vld [vmem:[%s413_s1 + $0x120] sm:$0xff] }
   0xb   :  { %113 = vmatpush.msra.mxu1 %v60_v20  ;;  %93 = vmatpush.msra.mxu0 %v59_v21  ;;  %v45_v30 = vld [vmem:[%s413_s1 + $0xf0] sm:$0xff]  ;;  %v46_v31 = vld [vmem:[%s413_s1 + $0xf8] sm:$0xff]  ;;  %v48_v32 = vld [vmem:[%s413_s1 + $0x108] sm:$0xff] }
   0xc   :  { %134 = vmatpush.msra.mxu2 %v57_v18  ;;  %154 = vmatpush.msra.mxu3 %v58_v19  ;;  %v47_v33 = vld [vmem:[%s413_s1 + $0x100] sm:$0xff]  ;;  %v41_v34 = vld [vmem:[%s413_s1 + $0xd0] sm:$0xff]  ;;  %v42_v35 = vld [vmem:[%s413_s1 + $0xd8] sm:$0xff] }
   0xd   :  { %114 = vmatpush.msra.mxu1 %v56_v24  ;;  %94 = vmatpush.msra.mxu0 %v55_v25  ;;  %v44_v36 = vld [vmem:[%s413_s1 + $0xe8] sm:$0xff]  ;;  %v43_v37 = vld [vmem:[%s413_s1 + $0xe0] sm:$0xff]  ;;  %v37_v38 = vld [vmem:[%s413_s1 + $0xb0] sm:$0xff] }
   0xe   :  { %135 = vmatpush.msra.mxu2 %v53_v22  ;;  %155 = vmatpush.msra.mxu3 %v54_v23  ;;  %v38_v39 = vld [vmem:[%s413_s1 + $0xb8] sm:$0xff]  ;;  %v40_v40 = vld [vmem:[%s413_s1 + $0xc8] sm:$0xff]  ;;  %v39_v41 = vld [vmem:[%s413_s1 + $0xc0] sm:$0xff] }
   0xf   :  { %115 = vmatpush.msra.mxu1 %v52_v28  ;;  %95 = vmatpush.msra.mxu0 %v51_v29  ;;  %v33_v42 = vld [vmem:[%s413_s1 + $0x90] sm:$0xff]  ;;  %v34_v43 = vld [vmem:[%s413_s1 + $0x98] sm:$0xff]  ;;  %v36_v44 = vld [vmem:[%s413_s1 + $0xa8] sm:$0xff] }
  0x10   :  { %136 = vmatpush.msra.mxu2 %v49_v26  ;;  %156 = vmatpush.msra.mxu3 %v50_v27  ;;  %v35_v45 = vld [vmem:[%s413_s1 + $0xa0] sm:$0xff]  ;;  %v29_v46 = vld [vmem:[%s413_s1 + $0x70] sm:$0xff]  ;;  %v30_v47 = vld [vmem:[%s413_s1 + $0x78] sm:$0xff] }
  0x11   :  { %116 = vmatpush.msra.mxu1 %v48_v32  ;;  %96 = vmatpush.msra.mxu0 %v47_v33  ;;  %v32_v48 = vld [vmem:[%s413_s1 + $0x88] sm:$0xff]  ;;  %v31_v49 = vld [vmem:[%s413_s1 + $0x80] sm:$0xff]  ;;  %v25_v50 = vld [vmem:[%s413_s1 + $0x50] sm:$0xff] }
  0x12   :  { %137 = vmatpush.msra.mxu2 %v45_v30  ;;  %157 = vmatpush.msra.mxu3 %v46_v31  ;;  %v26_v51 = vld [vmem:[%s413_s1 + $0x58] sm:$0xff]  ;;  %v28_v52 = vld [vmem:[%s413_s1 + $0x68] sm:$0xff]  ;;  %v27_v53 = vld [vmem:[%s413_s1 + $0x60] sm:$0xff] }
  0x13   :  { %117 = vmatpush.msra.mxu1 %v44_v36  ;;  %97 = vmatpush.msra.mxu0 %v43_v37  ;;  %v21_v54 = vld [vmem:[%s413_s1 + $0x30] sm:$0xff]  ;;  %v22_v55 = vld [vmem:[%s413_s1 + $0x38] sm:$0xff]  ;;  %v24_v56 = vld [vmem:[%s413_s1 + $0x48] sm:$0xff] }
  0x14   :  { %138 = vmatpush.msra.mxu2 %v41_v34  ;;  %158 = vmatpush.msra.mxu3 %v42_v35  ;;  %v23_v57 = vld [vmem:[%s413_s1 + $0x40] sm:$0xff]  ;;  %v17_v58 = vld [vmem:[%s413_s1 + $0x10] sm:$0xff]  ;;  %v18_v59 = vld [vmem:[%s413_s1 + $0x18] sm:$0xff] }
  0x15   :  { %118 = vmatpush.msra.mxu1 %v40_v40  ;;  %98 = vmatpush.msra.mxu0 %v39_v41  ;;  %v14_v60 = vld [vmem:[%s414_s0] sm:$0x1]  ;;  %v20_v61 = vld [vmem:[%s413_s1 + $0x28] sm:$0xff] }
  0x16   :  { %139 = vmatpush.msra.mxu2 %v37_v38  ;;  %159 = vmatpush.msra.mxu3 %v38_v39  ;;  %v19_v62 = vld [vmem:[%s413_s1 + $0x20] sm:$0xff]  ;;  %v16_v63 = vld [vmem:[%s413_s1 + $0x8] sm:$0xff] }
  0x17   :  { %119 = vmatpush.msra.mxu1 %v36_v44  ;;  %99 = vmatpush.msra.mxu0 %v35_v45  ;;  %v15_v0 = vld [vmem:[%s413_s1] sm:$0xff] }
  0x18   :  { %140 = vmatpush.msra.mxu2 %v33_v42  ;;  %160 = vmatpush.msra.mxu3 %v34_v43  ;;  %v79_v1 = vld [vmem:[%s415_s2] sm:$0xf] }
  0x19   :  { %120 = vmatpush.msra.mxu1 %v32_v48  ;;  %100 = vmatpush.msra.mxu0 %v31_v49  ;;  %v82_v2 = vperm.slane %v79_v1, 1  ;;  %v81_v3 = vperm.slane %v79_v1, 0  ;;  %v83_v4 = vperm.slane %v79_v1, 2  ;;  %v84_v5 = vperm.slane %v79_v1, 3 }
  0x1a   :  { %141 = vmatpush.msra.mxu2 %v29_v46  ;;  %161 = vmatpush.msra.mxu3 %v30_v47 }
  0x1b   :  { %121 = vmatpush.msra.mxu1 %v28_v52  ;;  %101 = vmatpush.msra.mxu0 %v27_v53 }
  0x1c   :  { %142 = vmatpush.msra.mxu2 %v25_v50  ;;  %162 = vmatpush.msra.mxu3 %v26_v51 }
  0x1d   :  { %122 = vmatpush.msra.mxu1 %v24_v56  ;;  %102 = vmatpush.msra.mxu0 %v23_v57 }
  0x1e   :  { %143 = vmatpush.msra.mxu2 %v21_v54  ;;  %163 = vmatpush.msra.mxu3 %v22_v55 }
  0x1f   :  { %123 = vmatpush.msra.mxu1 %v20_v61  ;;  %103 = vmatpush.msra.mxu0 %v19_v62 }
  0x20   :  { %144 = vmatpush.msra.mxu2 %v17_v58  ;;  %164 = vmatpush.msra.mxu3 %v18_v59 }
  0x21   :  { %145 = vmatmul.f32.vlgmr.msra.gmra.mxu2 %v14_v60  ;;  %165 = vmatmul.f32.vlgmr.msra.gmra.mxu3 %v14_v60 }
  0x22   :  { %124 = vmatpush.msra.mxu1 %v16_v63  ;;  %104 = vmatpush.msra.mxu0 %v15_v0 }
  0x23   :  { %125 = vmatmul.f32.vlgmr.msra.gmra.mxu1 %v14_v60  ;;  %105 = vmatmul.f32.vlgmr.msra.gmra.mxu0 %v14_v60 }
  0xa0   :  { %v126_v6 = vpop.f32.mrf.mxu1  ;;  %v106_v7 = vpop.f32.mrf.mxu0 }
  0xa1   :  { %v127_v8 = vadd.f32 %v126_v6, %v82_v2  ;;  %v107_v9 = vadd.f32 %v106_v7, %v81_v3 }
  0xa3   :  { %v173_v13 = vrot.slane %v127_v8, 7 }
  0xa4   :  { %v146_v10 = vpop.f32.mrf.mxu2  ;;  %v166_v11 = vpop.f32.mrf.mxu3 }
  0xa5   :  { %v147_v14 = vadd.f32 %v146_v10, %v83_v4  ;;  %v167_v15 = vadd.f32 %v166_v11, %v84_v5  ;;  %v177_v18 = vsel %vm176_vm0, %v107_v9, %v173_v13 }
  0xa7   :  { %v174_v16 = vrot.slane %v147_v14, 6  ;;  %v175_v17 = vrot.slane %v167_v15, 5 }
  0xa9   :  { %v179_v19 = vsel %vm178_vm1, %v174_v16, %v175_v17 }
  0xaa   :  { %v181_v20 = vsel %vm180_vm2, %v177_v18, %v179_v19 }
  0xab   :  { %187 = vst.msk [vmem:[%s416_s3] sm:$0xf] %vm185_vm3, %v181_v20 }

</bundles_post_ra>
